<compile_context>
chip_gen: v6e
topology: v6e:2x2x1
jax: 0.10.0
libtpu: 0.0.40
codegen_flags: <defaults>
</compile_context>

<pallas_src>
import jax
import jax.numpy as jnp
from jax.experimental import pallas as pl
from jax.experimental.pallas import tpu as pltpu

EPS = 1e-5


# ----------------------------------------------------------------------------
# Kernel
# ----------------------------------------------------------------------------
def mlp_kernel(x_ref, w1_ref, b1_ref, w2_ref, b2_ref, w3_ref, b3_ref, o_ref):
    # x tile arrives as f32 straight from HBM; cast to bf16 only for the MXU.
    x = x_ref[...].astype(w1_ref.dtype)

    # fc1 (BN1 folded in) + ReLU   -- dropout1 is identity in eval mode
    h1 = jnp.dot(x, w1_ref[...], preferred_element_type=jnp.float32) + b1_ref[...]
    h1 = jnp.maximum(h1, 0.0)

    # fc2 (BN2 folded in) + ReLU   -- dropout2 is identity in eval mode
    h2 = jnp.dot(h1.astype(w2_ref.dtype), w2_ref[...],
                 preferred_element_type=jnp.float32) + b2_ref[...]
    h2 = jnp.maximum(h2, 0.0)

    # fc3: N=1 output -> VPU multiply + lane reduction (skip the MXU)
    logits = jnp.sum(h2 * w3_ref[...], axis=-1, keepdims=True) + b3_ref[...]
    o_ref[...] = jax.nn.sigmoid(logits)


# ----------------------------------------------------------------------------
# Wrapper
# ----------------------------------------------------------------------------
def _round_up(n, m):
    return -(-n // m) * m


def mlp_forward(x, prepped, *, block_batch=4096):
    """x: [B, input_size] float32 -> [B, 1] float32 (eval-mode forward)."""
    B, K = x.shape
    assert K == prepped["w1"].shape[0], "feature dim mismatch with prepped params"

    # ---- batch tiling -------------------------------------------------------
    # Cap the tile so the f32 h1/h2 intermediates (+ double-buffered x / out)
    # stay a few MB -- well under v7x's 32 MiB scoped-VMEM default.
    MAX_TM = 8192
    bb = min(_round_up(block_batch, 8), MAX_TM)

    n_steps = max(1, -(-B // bb))            # ceil(B / block_batch)
    if B > 8:
        n_steps = max(n_steps, 2)            # keep v7x's second TensorCore busy
    if n_steps > 1 and n_steps % 2 == 1:
        n_steps += 1                         # balanced split across 2 TCs
    TM = min(_round_up(-(-B // n_steps), 8), MAX_TM)
    Bp = _round_up(B, TM)

    # Pad only the batch dim, and only when needed.  The feature dim is NOT
    # padded and x is NOT pre-cast: the kernel reads the f32 rows directly.
    if Bp != B:
        x = jnp.pad(x, ((0, Bp - B), (0, 0)))

    grid = (Bp // TM,)

    def resident(arr):
        # Whole-array block mapped to (0, 0) every step -> stays in VMEM.
        return pl.BlockSpec(arr.shape, lambda i: (0, 0))

    # Advisory scheduling hint for XLA (free when embedded in a larger graph).
    weight_bytes = sum(int(a.size) * a.dtype.itemsize for a in prepped.values())
    cost = pl.CostEstimate(
        flops=2 * Bp * (K * 128 + 128 * 64 + 64),
        transcendentals=Bp,                               # sigmoid
        bytes_accessed=Bp * (K * 4 + 4) + weight_bytes,   # f32 x in, f32 out
    )

    out = pl.pallas_call(
        mlp_kernel,
        out_shape=jax.ShapeDtypeStruct((Bp, 1), jnp.float32),
        grid=grid,
        in_specs=[
            pl.BlockSpec((TM, K), lambda i: (i, 0)),   # x: batch-tiled, raw f32
            resident(prepped["w1"]),
            resident(prepped["b1"]),
            resident(prepped["w2"]),
            resident(prepped["b2"]),
            resident(prepped["w3"]),
            resident(prepped["b3"]),
        ],
        out_specs=pl.BlockSpec((TM, 1), lambda i: (i, 0)),
        compiler_params=pltpu.CompilerParams(
            dimension_semantics=("parallel",)),
        cost_estimate=cost,
    )(x, prepped["w1"], prepped["b1"], prepped["w2"], prepped["b2"],
      prepped["w3"], prepped["b3"])

    return out[:B]


# ----------------------------------------------------------------------------
# Parameter prep: fold eval-mode BN into fc weights, cast matmul weights bf16
# ----------------------------------------------------------------------------
def prepare_params(p, input_size, *, matmul_dtype=jnp.bfloat16):
    def fold(w, b, g, be, m, v):
        scale = g * jax.lax.rsqrt(v + EPS)            # [1, out]
        return w * scale, (b - m) * scale + be        # w': [in,out], b': [1,out]

    w1f, b1f = fold(p["w1"], p["b1"], p["g1"], p["be1"], p["m1"], p["v1"])
    w2f, b2f = fold(p["w2"], p["b2"], p["g2"], p["be2"], p["m2"], p["v2"])

    # Cast matmul operands AFTER BN folding (avoid double rounding).
    # w1 stays unpadded [input_size, 128]; Mosaic handles the K=13 contraction.
    w1f = w1f.astype(matmul_dtype)
    w2f = w2f.astype(matmul_dtype)

    return dict(
        w1=w1f, b1=b1f.astype(jnp.float32),
        w2=w2f, b2=b2f.astype(jnp.float32),
        w3=p["w3"].T.astype(jnp.float32),   # [1, 64] row, used on the VPU
        b3=p["b3"].astype(jnp.float32),     # [1, 1]
    )


# ----------------------------------------------------------------------------
# Synthetic parameters matching MLPModel.__init__ shapes (eval mode)
# ----------------------------------------------------------------------------
def init_params(key, input_size):
    ks = jax.random.split(key, 8)

    def lin(kw, kb, fan_in, fan_out):
        bound = 1.0 / jnp.sqrt(fan_in)
        w = jax.random.uniform(kw, (fan_in, fan_out), jnp.float32, -bound, bound)
        b = jax.random.uniform(kb, (1, fan_out), jnp.float32, -bound, bound)
        return w, b

    w1, b1 = lin(ks[0], ks[1], input_size, 128)
    w2, b2 = lin(ks[2], ks[3], 128, 64)
    w3, b3 = lin(ks[4], ks[5], 64, 1)

    g1 = 1.0 + 0.1 * jax.random.normal(ks[6], (1, 128), jnp.float32)
    be1 = 0.05 * jax.random.normal(ks[7], (1, 128), jnp.float32)
    m1 = 0.01 * jnp.arange(128, dtype=jnp.float32).reshape(1, 128)
    v1 = 1.0 + 0.005 * jnp.arange(128, dtype=jnp.float32).reshape(1, 128)

    g2 = jnp.full((1, 64), 0.9, jnp.float32)
    be2 = jnp.full((1, 64), 0.02, jnp.float32)
    m2 = 0.02 * jnp.arange(64, dtype=jnp.float32).reshape(1, 64)
    v2 = 1.0 + 0.01 * jnp.arange(64, dtype=jnp.float32).reshape(1, 64)

    return dict(w1=w1, b1=b1, g1=g1, be1=be1, m1=m1, v1=v1,
                w2=w2, b2=b2, g2=g2, be2=be2, m2=m2, v2=v2,
                w3=w3, b3=b3)


# ----------------------------------------------------------------------------
# References
# ----------------------------------------------------------------------------
def reference_forward_f32(x, p):
    """Full-precision reference of the original (unfolded) module, eval mode."""
    h1 = x @ p["w1"] + p["b1"]
    h1 = (h1 - p["m1"]) * (p["g1"] * jax.lax.rsqrt(p["v1"] + EPS)) + p["be1"]
    h1 = jnp.maximum(h1, 0.0)
    h2 = h1 @ p["w2"] + p["b2"]
    h2 = (h2 - p["m2"]) * (p["g2"] * jax.lax.rsqrt(p["v2"] + EPS)) + p["be2"]
    h2 = jnp.maximum(h2, 0.0)
    return jax.nn.sigmoid(h2 @ p["w3"] + p["b3"])


def reference_forward_prepped(x, pp):
    """Reference using the exact prepped (BN-folded, bf16) operands."""
    xq = x.astype(pp["w1"].dtype)
    h1 = jnp.dot(xq, pp["w1"], preferred_element_type=jnp.float32) + pp["b1"]
    h1 = jnp.maximum(h1, 0.0)
    h2 = jnp.dot(h1.astype(pp["w2"].dtype), pp["w2"],
                 preferred_element_type=jnp.float32) + pp["b2"]
    h2 = jnp.maximum(h2, 0.0)
    logits = jnp.sum(h2 * pp["w3"], axis=-1, keepdims=True) + pp["b3"]
    return jax.nn.sigmoid(logits)


# ----------------------------------------------------------------------------
if __name__ == "__main__":
    input_size = 13   # heart.csv feature count
    batch = 8

    key = jax.random.PRNGKey(0)
    kx, kp = jax.random.split(key)
    x = jax.random.normal(kx, (batch, input_size), jnp.float32)

    params = init_params(kp, input_size)
    prepped = prepare_params(params, input_size)

    out = mlp_forward(x, prepped)
    out = jax.block_until_ready(out)
    assert out.shape == (batch, 1)

    # Exact-operand check (same bf16 matmul operands, f32 accumulate).
    ref_q = reference_forward_prepped(x, prepped)
    assert jnp.allclose(out, ref_q, atol=1e-3, rtol=1e-3), "mismatch vs prepped reference"

    # Semantics check vs the full-precision original module (bf16 tolerance).
    ref_f32 = reference_forward_f32(x, params)
    assert jnp.allclose(out, ref_f32, atol=2e-2, rtol=2e-2), "mismatch vs f32 reference"

    print("KERNEL_OK")
</pallas_src>

<mosaic_0001>
module attributes {stable_mosaic.version = 11 : i64} {
  func.func @mlp_kernel(%arg0: i32, %arg1: memref<8x13xf32, #tpu.memory_space<vmem>>, %arg2: memref<13x128xbf16, #tpu.memory_space<vmem>>, %arg3: memref<1x128xf32, #tpu.memory_space<vmem>>, %arg4: memref<128x64xbf16, #tpu.memory_space<vmem>>, %arg5: memref<1x64xf32, #tpu.memory_space<vmem>>, %arg6: memref<1x64xf32, #tpu.memory_space<vmem>>, %arg7: memref<1x1xf32, #tpu.memory_space<vmem>>, %arg8: memref<8x1xf32, #tpu.memory_space<vmem>>) attributes {dimension_semantics = [#tpu.dimension_semantics<parallel>], iteration_bounds = array<i64: 1>, scalar_prefetch = 0 : i64, scratch_operands = 0 : i64, tpu.core_type = #tpu.core_type<tc>, window_params = [{transform_indices = @transform_0, window_bounds = array<i64: 8, 13>}, {pipeline_mode = #tpu.pipeline_mode<synchronous>, transform_indices = @transform_1, window_bounds = array<i64: 13, 128>}, {pipeline_mode = #tpu.pipeline_mode<synchronous>, transform_indices = @transform_2, window_bounds = array<i64: 1, 128>}, {pipeline_mode = #tpu.pipeline_mode<synchronous>, transform_indices = @transform_3, window_bounds = array<i64: 128, 64>}, {pipeline_mode = #tpu.pipeline_mode<synchronous>, transform_indices = @transform_4, window_bounds = array<i64: 1, 64>}, {pipeline_mode = #tpu.pipeline_mode<synchronous>, transform_indices = @transform_5, window_bounds = array<i64: 1, 64>}, {pipeline_mode = #tpu.pipeline_mode<synchronous>, transform_indices = @transform_6, window_bounds = array<i64: 1, 1>}, {transform_indices = @transform_7, window_bounds = array<i64: 8, 1>}]} {
    %c0 = arith.constant 0 : index
    %c0_0 = arith.constant 0 : index
    %0 = vector.load %arg1[%c0, %c0_0] : memref<8x13xf32, #tpu.memory_space<vmem>>, vector<8x13xf32>
    %1 = arith.truncf %0 : vector<8x13xf32> to vector<8x13xbf16>
    %c0_1 = arith.constant 0 : index
    %c0_2 = arith.constant 0 : index
    %2 = vector.load %arg2[%c0_1, %c0_2] : memref<13x128xbf16, #tpu.memory_space<vmem>>, vector<13x128xbf16>
    %cst = arith.constant dense<0.000000e+00> : vector<8x128xf32>
    %3 = tpu.matmul %1, %2, %cst {dimension_numbers = #tpu.dot_dimension_numbers<[1], [0], [0], [1], [0, 0, 1, 1], [], []>} : vector<8x13xbf16>, vector<13x128xbf16>, vector<8x128xf32> -> vector<8x128xf32>
    %c0_3 = arith.constant 0 : index
    %c0_4 = arith.constant 0 : index
    %4 = vector.load %arg3[%c0_3, %c0_4] : memref<1x128xf32, #tpu.memory_space<vmem>>, vector<1x128xf32>
    %5 = vector.broadcast %4 : vector<1x128xf32> to vector<8x128xf32>
    %6 = arith.addf %3, %5 : vector<8x128xf32>
    %cst_5 = arith.constant 0.000000e+00 : f32
    %7 = vector.broadcast %cst_5 : f32 to vector<8x128xf32>
    %8 = arith.maximumf %6, %7 : vector<8x128xf32>
    %9 = arith.truncf %8 : vector<8x128xf32> to vector<8x128xbf16>
    %c0_6 = arith.constant 0 : index
    %c0_7 = arith.constant 0 : index
    %10 = vector.load %arg4[%c0_6, %c0_7] : memref<128x64xbf16, #tpu.memory_space<vmem>>, vector<128x64xbf16>
    %cst_8 = arith.constant dense<0.000000e+00> : vector<8x64xf32>
    %11 = tpu.matmul %9, %10, %cst_8 {dimension_numbers = #tpu.dot_dimension_numbers<[1], [0], [0], [1], [0, 0, 1, 1], [], []>} : vector<8x128xbf16>, vector<128x64xbf16>, vector<8x64xf32> -> vector<8x64xf32>
    %c0_9 = arith.constant 0 : index
    %c0_10 = arith.constant 0 : index
    %12 = vector.load %arg5[%c0_9, %c0_10] : memref<1x64xf32, #tpu.memory_space<vmem>>, vector<1x64xf32>
    %13 = vector.broadcast %12 : vector<1x64xf32> to vector<8x64xf32>
    %14 = arith.addf %11, %13 : vector<8x64xf32>
    %cst_11 = arith.constant 0.000000e+00 : f32
    %15 = vector.broadcast %cst_11 : f32 to vector<8x64xf32>
    %16 = arith.maximumf %14, %15 : vector<8x64xf32>
    %c0_12 = arith.constant 0 : index
    %c0_13 = arith.constant 0 : index
    %17 = vector.load %arg6[%c0_12, %c0_13] : memref<1x64xf32, #tpu.memory_space<vmem>>, vector<1x64xf32>
    %18 = vector.broadcast %17 : vector<1x64xf32> to vector<8x64xf32>
    %19 = arith.mulf %16, %18 : vector<8x64xf32>
    %cst_14 = arith.constant dense<0.000000e+00> : vector<8xf32>
    %20 = vector.multi_reduction <add>, %19, %cst_14 [1] : vector<8x64xf32> to vector<8xf32>
    %21 = vector.shape_cast %20 : vector<8xf32> to vector<8x1xf32>
    %c0_15 = arith.constant 0 : index
    %c0_16 = arith.constant 0 : index
    %22 = vector.load %arg7[%c0_15, %c0_16] : memref<1x1xf32, #tpu.memory_space<vmem>>, vector<1x1xf32>
    %23 = vector.broadcast %22 : vector<1x1xf32> to vector<8x1xf32>
    %24 = arith.addf %21, %23 : vector<8x1xf32>
    %25 = arith.negf %24 : vector<8x1xf32>
    %26 = math.exp %25 : vector<8x1xf32>
    %cst_17 = arith.constant 1.000000e+00 : f32
    %27 = vector.broadcast %cst_17 : f32 to vector<8x1xf32>
    %28 = arith.addf %27, %26 : vector<8x1xf32>
    %29 = arith.divf %27, %28 : vector<8x1xf32>
    %c0_18 = arith.constant 0 : index
    %c0_19 = arith.constant 0 : index
    %30 = vector.load %arg8[%c0_18, %c0_19] : memref<8x1xf32, #tpu.memory_space<vmem>>, vector<8x1xf32>
    tpu.vector_store %arg8[%c0_18, %c0_19], %29 {strides = array<i32>} : memref<8x1xf32, #tpu.memory_space<vmem>>, vector<8x1xf32>,
    return
  }
  func.func @transform_0(%arg0: i32) -> (i32, i32) {
    %c0_i32 = arith.constant 0 : i32
    %c0_i32_0 = arith.constant 0 : i32
    return %arg0, %c0_i32 : i32, i32
  }
  func.func @transform_1(%arg0: i32) -> (i32, i32) {
    %c0_i32 = arith.constant 0 : i32
    %c0_i32_0 = arith.constant 0 : i32
    %c0_i32_1 = arith.constant 0 : i32
    return %c0_i32, %c0_i32_0 : i32, i32
  }
  func.func @transform_2(%arg0: i32) -> (i32, i32) {
    %c0_i32 = arith.constant 0 : i32
    %c0_i32_0 = arith.constant 0 : i32
    %c0_i32_1 = arith.constant 0 : i32
    return %c0_i32, %c0_i32_0 : i32, i32
  }
  func.func @transform_3(%arg0: i32) -> (i32, i32) {
    %c0_i32 = arith.constant 0 : i32
    %c0_i32_0 = arith.constant 0 : i32
    %c0_i32_1 = arith.constant 0 : i32
    return %c0_i32, %c0_i32_0 : i32, i32
  }
  func.func @transform_4(%arg0: i32) -> (i32, i32) {
    %c0_i32 = arith.constant 0 : i32
    %c0_i32_0 = arith.constant 0 : i32
    %c0_i32_1 = arith.constant 0 : i32
    return %c0_i32, %c0_i32_0 : i32, i32
  }
  func.func @transform_5(%arg0: i32) -> (i32, i32) {
    %c0_i32 = arith.constant 0 : i32
    %c0_i32_0 = arith.constant 0 : i32
    %c0_i32_1 = arith.constant 0 : i32
    return %c0_i32, %c0_i32_0 : i32, i32
  }
  func.func @transform_6(%arg0: i32) -> (i32, i32) {
    %c0_i32 = arith.constant 0 : i32
    %c0_i32_0 = arith.constant 0 : i32
    %c0_i32_1 = arith.constant 0 : i32
    return %c0_i32, %c0_i32_0 : i32, i32
  }
  func.func @transform_7(%arg0: i32) -> (i32, i32) {
    %c0_i32 = arith.constant 0 : i32
    %c0_i32_0 = arith.constant 0 : i32
    return %arg0, %c0_i32 : i32, i32
  }
}

</mosaic_0001>

<bundles_post_ra>
// kernel: tpu_custom_call.1
= control target key start
LH: loop header
LB: loop body
LE: loop exit
PB: predicated region body
PF: predicated region fallthrough
CT: control target
= control target key end

     0   :  { %vm49_vm0 = vcmask 1045504   ;;  %vm50_vm1 = vcmask 1046528   ;;  %v310_v0 = vmov 0.0   ;;  %v311_v2 = vmov 65535   ;;  %s398_s1 = inlined_call_operand.vmem [shape: bf16[13,128], index: 1, kind: input, shape index: {}]   ;;  %s399_s0 = inlined_call_operand.vmem [shape: f32[8,13], index: 0, kind: input, shape index: {}]   ;;  %s400_s3 = inlined_call_operand.vmem [shape: bf16[128,64], index: 3, kind: input, shape index: {}]   ;;  %s401_s2 = inlined_call_operand.vmem [shape: f32[1,128], index: 2, kind: input, shape index: {}]   ;;  %s402_s6 = inlined_call_operand.<no memory space> [shape: f32[1,1], index: 6, kind: input, shape index: {}]   ;;  %s403_s4 = inlined_call_operand.vmem [shape: f32[1,64], index: 4, kind: input, shape index: {}]   ;;  %s404_s5 = inlined_call_operand.vmem [shape: f32[1,64], index: 5, kind: input, shape index: {}]   ;;  %s405_s7 = inlined_call_operand.vmem [shape: f32[8,1], index: 7, kind: output, shape index: {}]  }
   0x1   :  { %268 = vmatprep.subr.bf16.mxu0 %v310_v0  ;;  %v297_v1 = vld [vmem:[%s398_s1] sm:$0x7f]   ;;  %274 = vmatprep.subr.bf16.mxu1 %v310_v0  ;;  %v51_v3 = vsel %vm49_vm0, 4294967295, %v311_v2  ;;  %vm312_vm2 = vmmov 0   ;;  %v298_v6 = vld [vmem:[%s400_s3 + $0x38] sm:$0xff]   ;;  %v299_v9 = vld [vmem:[%s400_s3 + $0x30] sm:$0xff]   ;;  %v12_v24 = vstv %s402_s6 }
   0x2   :  { %v29_v4 = vld [vmem:[%s399_s0] sm:$0xff]  ;;  %v52_v5 = vsel %vm50_vm1, %v51_v3, 0  ;;  %270 = vmatprep.mubr.msk.bf16.mxu0 %vm312_vm2, %v310_v0  ;;  %290 = vmatprep.mubr.msk.bf16.mxu1 %vm312_vm2, %v310_v0  ;;  %vm45_vm3 = vcmask 105472   ;;  %v300_v10 = vld [vmem:[%s400_s3 + $0x28] sm:$0xff]   ;;  %v302_v12 = vld [vmem:[%s400_s3 + $0x18] sm:$0xff]   ;;  %vm218_vm4 = vcmask 523264  }
   0x3   :  { %v54_v7 = vand.u32 %v297_v1, %v52_v5  ;;  %v30_v8 = vpack.c.bf16 %v29_v4, %v29_v4  ;;  %275 = vmatpush3.bf16.msra.mxu1 %v298_v6  ;;  %v301_v11 = vld [vmem:[%s400_s3 + $0x20] sm:$0xff]   ;;  %v303_v13 = vld [vmem:[%s400_s3 + $0x10] sm:$0xff]   ;;  %v304_v14 = vld [vmem:[%s400_s3 + $0x8] sm:$0xff]   ;;  %13 = vst [vmem:[#allocation2] sm:$0x1] %v12_v24  ;;  %vm236_vm5 = vcmask 7168  }
   0x4   :  { %276 = vmatprep.subr.bf16.mxu1 %v310_v0  ;;  %v305_v15 = vld [vmem:[%s400_s3] sm:$0xff]  }
   0x5   :  { %269 = vmatpush3.bf16.msra.mxu0 %v54_v7  ;;  %v242_v16 = vld [vmem:[%s401_s2] ss:$0 sm:$0xff] }
   0x6   :  { %v245_v25 = vld [vmem:[%s403_s4] ss:$0 sm:$0xff] }
   0x7   :  { %277 = vmatpush3.bf16.msra.mxu1 %v299_v9  ;;  %v254_v29 = vld [vmem:[%s404_s5] ss:$0 sm:$0xff] }
   0x8   :  { %271 = vmatmul.mubr.msk.bf16.vlgmr.msra.gmra.mxu0 %vm45_vm3, %v30_v8  ;;  %278 = vmatprep.subr.bf16.mxu1 %v310_v0 }
   0xa   :  { %v255_v35 = vld [vmem:[#allocation2] ss:$0 sm:$0xff] }
   0xb   :  { %279 = vmatpush3.bf16.msra.mxu1 %v300_v10 }
   0xc   :  { %280 = vmatprep.subr.bf16.mxu1 %v310_v0 }
   0xf   :  { %281 = vmatpush3.bf16.msra.mxu1 %v301_v11 }
  0x10   :  { %282 = vmatprep.subr.bf16.mxu1 %v310_v0 }
  0x13   :  { %283 = vmatpush3.bf16.msra.mxu1 %v302_v12 }
  0x14   :  { %284 = vmatprep.subr.bf16.mxu1 %v310_v0 }
  0x17   :  { %285 = vmatpush3.bf16.msra.mxu1 %v303_v13 }
  0x18   :  { %286 = vmatprep.subr.bf16.mxu1 %v310_v0 }
  0x1b   :  { %287 = vmatpush3.bf16.msra.mxu1 %v304_v14 }
  0x1c   :  { %288 = vmatprep.subr.bf16.mxu1 %v310_v0 }
  0x1f   :  { %289 = vmatpush3.bf16.msra.mxu1 %v305_v15 }
  0xc8   :  { %v90_v17 = vpop.f32.mrf.mxu0 }
  0xc9   :  { %v91_v18 = vadd.f32 %v242_v16, %v90_v17 }
  0xca   :  { %v272_v19 = vpop.f32.mrf.mxu0 }
  0xcb   :  { %v96_v20 = vmax.f32 %v91_v18, 0.0 }
  0xcc   :  { %v93_v21 = vpop.f32.mrf.mxu0 }
  0xcd   :  { %v97_v22 = vpack.c.bf16 %v96_v20, %v96_v20 }
  0xce   :  { %v273_v23 = vpop.f32.mrf.mxu0 }
  0xcf   :  { %291 = vmatmul.mubr.bf16.vlgmr.msra.gmra.mxu1 %v97_v22 }
 0x18f   :  { %v203_v26 = vpop.f32.mrf.mxu1 }
 0x190   :  { %v204_v27 = vadd.f32 %v245_v25, %v203_v26 }
 0x191   :  { %v292_v28 = vpop.f32.mrf.mxu1 }
 0x192   :  { %v209_v30 = vmax.f32 %v204_v27, 0.0 }
 0x193   :  { %v206_v31 = vpop.f32.mrf.mxu1 }
 0x194   :  { %v217_v32 = vmul.f32 %v254_v29, %v209_v30 }
 0x195   :  { %v293_v33 = vpop.f32.mrf.mxu1 }
 0x196   :  { %v219_v34 = vsel %vm218_vm4, %v217_v32, 0.0 }
 0x197   :  { %220 = vadd.xlane.f32.xlu0 %v219_v34 }
 0x220   :  { %v221_v36 = vpop.xlane.xlu0 %220 }
 0x221   :  { %v229_v37 = vadd.f32 %v255_v35, %v221_v36 }
 0x223   :  { %v256_v38 = vmul.f32 -1.442695, %v229_v37 }
 0x225   :  { %306 = vpow2.f32 %v256_v38 }
 0x232   :  { %v307_v39 = vpop.eup %306 }
 0x233   :  { %v233_v40 = vadd.f32 1.0, %v307_v39 }
 0x235   :  { %308 = vrcp.f32 %v233_v40 }
 0x242   :  { %v309_v41 = vpop.eup %308 }
 0x243   :  { %237 = vst.msk [vmem:[%s405_s7] sm:$0xff] %vm236_vm5, %v309_v41 }

</bundles_post_ra>
